<compile_context>
chip_gen: v7x
topology: tpu7x:2x2x1
jax: 0.10.0
libtpu: 0.0.40
codegen_flags: <defaults>
</compile_context>

<pallas_src>
import functools

import jax
import jax.numpy as jnp
import numpy as np
from jax.experimental import pallas as pl
from jax.experimental.pallas import tpu as pltpu


# ---------------------------------------------------------------------------
# Tiling helpers
# ---------------------------------------------------------------------------
def _round_up(x, m):
    return ((x + m - 1) // m) * m


def _choose_tm(S, target=512):
    """Token-tile size. Small S -> one 16-aligned tile (bf16 sublane packing);
    large S -> the 128-aligned candidate <= target that minimizes padding."""
    if S <= target:
        return max(16, _round_up(S, 16))
    best_pad, best_tm = None, None
    for tm in (512, 384, 256, 128):
        pad = _round_up(S, tm)
        if best_pad is None or pad < best_pad or (pad == best_pad and tm > best_tm):
            best_pad, best_tm = pad, tm
    return best_tm


# ---------------------------------------------------------------------------
# Fused kernel: RMSNorm + adaLN modulate + output projection + bias
# ---------------------------------------------------------------------------
def _final_layer_kernel(x_ref, g_ref, shift_ref, scale_ref, w_ref, b_ref,
                        o_ref, *, eps):
    x = x_ref[0].astype(jnp.float32)           # [tm, D]  (bf16 in, f32 math)
    g = g_ref[...].astype(jnp.float32)         # [1, D]
    shift = shift_ref[0].astype(jnp.float32)   # [1, D]  (this batch row only)
    scale = scale_ref[0].astype(jnp.float32)   # [1, D]

    # RMSNorm (f32) fused with adaLN modulation on the resident token tile.
    rms = jax.lax.rsqrt(jnp.mean(x * x, axis=-1, keepdims=True) + eps)
    h = (x * rms) * g
    h = h * (1.0 + scale) + shift

    # Output projection on the MXU: bf16 operands, f32 accumulation.
    y = jnp.dot(h.astype(w_ref.dtype), w_ref[...],
                preferred_element_type=jnp.float32)
    o_ref[0] = (y + b_ref[...].astype(jnp.float32)).astype(o_ref.dtype)


def final_layer_forward(x, adaln_input, params, *, tm=512, eps=1e-6,
                        compute_dtype=jnp.bfloat16):
    """Mirrors FinalLayer.forward.  x: [B, S, D], adaln_input: [B, D]."""
    B, S, D = x.shape
    out_dim = params["linear_w"].shape[1]

    # ---- adaLN modulation: tiny GEMM (M = B), plain XLA per perf review ----
    a = adaln_input.astype(jnp.float32)
    h = a * jax.nn.sigmoid(a)                                      # SiLU
    mod = (jnp.dot(h, params["ada_w"].astype(jnp.float32),
                   precision=jax.lax.Precision.HIGHEST)
           + params["ada_b"].astype(jnp.float32))
    shift = mod[:, :D].reshape(B, 1, D)
    scale = mod[:, D:].reshape(B, 1, D)

    # ---- tiling / padding ---------------------------------------------------
    tm = _choose_tm(S, tm)
    S_pad = _round_up(S, tm)
    N_pad = _round_up(out_dim, 128)            # lane-dense output stores

    x_c = x.astype(compute_dtype)
    if S_pad != S:
        x_c = jnp.pad(x_c, ((0, 0), (0, S_pad - S), (0, 0)))
    w = params["linear_w"].astype(compute_dtype)
    b = params["linear_b"].astype(jnp.float32)
    if N_pad != out_dim:
        w = jnp.pad(w, ((0, 0), (0, N_pad - out_dim)))
        b = jnp.pad(b, ((0, N_pad - out_dim),))
    b = b.reshape(1, N_pad)
    g = params["rms_g"].astype(jnp.float32).reshape(1, D)

    grid = (B, S_pad // tm)

    # ---- VMEM budget (double-buffered tiles + resident weight) -------------
    xb = jnp.dtype(compute_dtype).itemsize
    ob = jnp.dtype(x.dtype).itemsize
    need = (2 * tm * D * xb                    # x tiles (double-buffered)
            + 2 * D * N_pad * xb               # projection weight
            + 2 * tm * N_pad * ob              # output tiles
            + 16 * D * 4 + 4 * N_pad * 4)      # gamma / shift / scale / bias
    vmem_limit = int(max(min(2 * need, 64 * 1024 * 1024), 32 * 1024 * 1024))

    cost = pl.CostEstimate(
        flops=2 * B * S_pad * D * N_pad + 8 * B * S_pad * D,
        transcendentals=B * S_pad,
        bytes_accessed=(x_c.size * xb + w.size * xb
                        + B * S_pad * N_pad * ob + 4 * B * D * 4),
    )

    out = pl.pallas_call(
        functools.partial(_final_layer_kernel, eps=eps),
        out_shape=jax.ShapeDtypeStruct((B, S_pad, N_pad), x.dtype),
        grid=grid,
        in_specs=[
            pl.BlockSpec((1, tm, D), lambda bi, mi: (bi, mi, 0)),   # x tile
            pl.BlockSpec((1, D), lambda bi, mi: (0, 0)),            # rms gamma
            pl.BlockSpec((1, 1, D), lambda bi, mi: (bi, 0, 0)),     # shift row
            pl.BlockSpec((1, 1, D), lambda bi, mi: (bi, 0, 0)),     # scale row
            pl.BlockSpec((D, N_pad), lambda bi, mi: (0, 0)),        # W (resident)
            pl.BlockSpec((1, N_pad), lambda bi, mi: (0, 0)),        # bias
        ],
        out_specs=pl.BlockSpec((1, tm, N_pad), lambda bi, mi: (bi, mi, 0)),
        compiler_params=pltpu.CompilerParams(
            dimension_semantics=("parallel", "parallel"),
            vmem_limit_bytes=vmem_limit),
        cost_estimate=cost,
    )(x_c, g, shift, scale, w, b)

    return out[:, :S, :out_dim]


# ---------------------------------------------------------------------------
# Parameters (projection weight pre-transposed to [in, out] and stored bf16;
# small adaLN / norm / bias params kept f32)
# ---------------------------------------------------------------------------
def init_params(key, *, hidden_size, patch_size, out_channels,
                weight_dtype=jnp.bfloat16):
    out_dim = patch_size * patch_size * out_channels
    k = jax.random.split(key, 5)
    s = 0.02
    return dict(
        rms_g=1.0 + 0.1 * jax.random.normal(k[0], (hidden_size,), jnp.float32),
        ada_w=s * jax.random.normal(k[1], (hidden_size, 2 * hidden_size),
                                    jnp.float32),
        ada_b=s * jax.random.normal(k[2], (2 * hidden_size,), jnp.float32),
        linear_w=(s * jax.random.normal(k[3], (hidden_size, out_dim),
                                        jnp.float32)).astype(weight_dtype),
        linear_b=s * jax.random.normal(k[4], (out_dim,), jnp.float32),
    )


# ---------------------------------------------------------------------------
# Pure-JAX reference (module semantics, f32 / HIGHEST precision)
# ---------------------------------------------------------------------------
def reference_forward(x, adaln_input, params, eps=1e-6):
    hp = jax.lax.Precision.HIGHEST
    D = x.shape[-1]
    xf = x.astype(jnp.float32)
    a = adaln_input.astype(jnp.float32)
    h = a * jax.nn.sigmoid(a)
    mod = jnp.dot(h, params["ada_w"].astype(jnp.float32), precision=hp) \
        + params["ada_b"].astype(jnp.float32)
    shift, scale = mod[:, :D], mod[:, D:]
    xn = xf * jax.lax.rsqrt(jnp.mean(xf * xf, axis=-1, keepdims=True) + eps)
    xn = xn * params["rms_g"].astype(jnp.float32)
    y = xn * (1.0 + scale[:, None, :]) + shift[:, None, :]
    return jnp.dot(y, params["linear_w"].astype(jnp.float32), precision=hp) \
        + params["linear_b"].astype(jnp.float32)


if __name__ == "__main__":
    B, S = 2, 64                       # batch, tokens
    HIDDEN, PATCH, OUT_CH = 128, 4, 8  # out_dim = 4*4*8 = 128 (lane-dense)

    key = jax.random.PRNGKey(0)
    kx, ka, kp = jax.random.split(key, 3)
    x = jax.random.normal(kx, (B, S, HIDDEN), jnp.float32).astype(jnp.bfloat16)
    adaln_input = jax.random.normal(ka, (B, HIDDEN), jnp.float32)
    params = init_params(kp, hidden_size=HIDDEN, patch_size=PATCH,
                         out_channels=OUT_CH)

    out = jax.block_until_ready(final_layer_forward(x, adaln_input, params))
    assert out.shape == (B, S, PATCH * PATCH * OUT_CH), out.shape

    ref = reference_forward(x, adaln_input, params)
    np.testing.assert_allclose(np.asarray(out.astype(jnp.float32)),
                               np.asarray(ref), rtol=2e-2, atol=2e-2)

    print("KERNEL_OK")
</pallas_src>

<mosaic_0001>
module attributes {stable_mosaic.version = 11 : i64} {
  func.func @_final_layer_kernel(%arg0: i32, %arg1: i32, %arg2: memref<1x64x128xbf16, #tpu.memory_space<vmem>>, %arg3: memref<1x128xf32, #tpu.memory_space<vmem>>, %arg4: memref<1x1x128xf32, #tpu.memory_space<vmem>>, %arg5: memref<1x1x128xf32, #tpu.memory_space<vmem>>, %arg6: memref<128x128xbf16, #tpu.memory_space<vmem>>, %arg7: memref<1x128xf32, #tpu.memory_space<vmem>>, %arg8: memref<1x64x128xbf16, #tpu.memory_space<vmem>>) attributes {dimension_semantics = [#tpu.dimension_semantics<parallel>, #tpu.dimension_semantics<parallel>], iteration_bounds = array<i64: 2, 1>, scalar_prefetch = 0 : i64, scratch_operands = 0 : i64, tpu.core_type = #tpu.core_type<tc>, window_params = [{transform_indices = @transform_0, window_bounds = array<i64: 1, 64, 128>}, {pipeline_mode = #tpu.pipeline_mode<synchronous>, transform_indices = @transform_1, window_bounds = array<i64: 1, 128>}, {transform_indices = @transform_2, window_bounds = array<i64: 1, 1, 128>}, {transform_indices = @transform_3, window_bounds = array<i64: 1, 1, 128>}, {pipeline_mode = #tpu.pipeline_mode<synchronous>, transform_indices = @transform_4, window_bounds = array<i64: 128, 128>}, {pipeline_mode = #tpu.pipeline_mode<synchronous>, transform_indices = @transform_5, window_bounds = array<i64: 1, 128>}, {transform_indices = @transform_6, window_bounds = array<i64: 1, 64, 128>}]} {
    %c0 = arith.constant 0 : index
    %c0_0 = arith.constant 0 : index
    %c0_1 = arith.constant 0 : index
    %0 = vector.load %arg2[%c0, %c0_0, %c0_1] : memref<1x64x128xbf16, #tpu.memory_space<vmem>>, vector<1x64x128xbf16>
    %1 = vector.shape_cast %0 : vector<1x64x128xbf16> to vector<64x128xbf16>
    %2 = arith.extf %1 : vector<64x128xbf16> to vector<64x128xf32>
    %c0_2 = arith.constant 0 : index
    %c0_3 = arith.constant 0 : index
    %3 = vector.load %arg3[%c0_2, %c0_3] : memref<1x128xf32, #tpu.memory_space<vmem>>, vector<1x128xf32>
    %c0_4 = arith.constant 0 : index
    %c0_5 = arith.constant 0 : index
    %c0_6 = arith.constant 0 : index
    %4 = vector.load %arg4[%c0_4, %c0_5, %c0_6] : memref<1x1x128xf32, #tpu.memory_space<vmem>>, vector<1x1x128xf32>
    %5 = vector.shape_cast %4 : vector<1x1x128xf32> to vector<1x128xf32>
    %c0_7 = arith.constant 0 : index
    %c0_8 = arith.constant 0 : index
    %c0_9 = arith.constant 0 : index
    %6 = vector.load %arg5[%c0_7, %c0_8, %c0_9] : memref<1x1x128xf32, #tpu.memory_space<vmem>>, vector<1x1x128xf32>
    %7 = vector.shape_cast %6 : vector<1x1x128xf32> to vector<1x128xf32>
    %8 = arith.mulf %2, %2 : vector<64x128xf32>
    %cst = arith.constant dense<0.000000e+00> : vector<64xf32>
    %9 = vector.multi_reduction <add>, %8, %cst [1] : vector<64x128xf32> to vector<64xf32>
    %10 = vector.shape_cast %9 : vector<64xf32> to vector<64x1xf32>
    %cst_10 = arith.constant 1.280000e+02 : f32
    %11 = vector.broadcast %cst_10 : f32 to vector<64x1xf32>
    %12 = arith.divf %10, %11 : vector<64x1xf32>
    %cst_11 = arith.constant 9.99999997E-7 : f32
    %13 = vector.broadcast %cst_11 : f32 to vector<64x1xf32>
    %14 = arith.addf %12, %13 : vector<64x1xf32>
    %15 = math.rsqrt %14 : vector<64x1xf32>
    %16 = vector.broadcast %15 : vector<64x1xf32> to vector<64x128xf32>
    %17 = arith.mulf %2, %16 : vector<64x128xf32>
    %18 = vector.broadcast %3 : vector<1x128xf32> to vector<64x128xf32>
    %19 = arith.mulf %17, %18 : vector<64x128xf32>
    %cst_12 = arith.constant 1.000000e+00 : f32
    %20 = vector.broadcast %cst_12 : f32 to vector<1x128xf32>
    %21 = arith.addf %20, %7 : vector<1x128xf32>
    %22 = vector.broadcast %21 : vector<1x128xf32> to vector<64x128xf32>
    %23 = arith.mulf %19, %22 : vector<64x128xf32>
    %24 = vector.broadcast %5 : vector<1x128xf32> to vector<64x128xf32>
    %25 = arith.addf %23, %24 : vector<64x128xf32>
    %26 = arith.truncf %25 : vector<64x128xf32> to vector<64x128xbf16>
    %c0_13 = arith.constant 0 : index
    %c0_14 = arith.constant 0 : index
    %27 = vector.load %arg6[%c0_13, %c0_14] : memref<128x128xbf16, #tpu.memory_space<vmem>>, vector<128x128xbf16>
    %cst_15 = arith.constant dense<0.000000e+00> : vector<64x128xf32>
    %28 = tpu.matmul %26, %27, %cst_15 {dimension_numbers = #tpu.dot_dimension_numbers<[1], [0], [0], [1], [0, 0, 1, 1], [], []>} : vector<64x128xbf16>, vector<128x128xbf16>, vector<64x128xf32> -> vector<64x128xf32>
    %c0_16 = arith.constant 0 : index
    %c0_17 = arith.constant 0 : index
    %29 = vector.load %arg7[%c0_16, %c0_17] : memref<1x128xf32, #tpu.memory_space<vmem>>, vector<1x128xf32>
    %30 = vector.broadcast %29 : vector<1x128xf32> to vector<64x128xf32>
    %31 = arith.addf %28, %30 : vector<64x128xf32>
    %32 = arith.truncf %31 : vector<64x128xf32> to vector<64x128xbf16>
    %c0_18 = arith.constant 0 : index
    %c0_19 = arith.constant 0 : index
    %c0_20 = arith.constant 0 : index
    %33 = vector.load %arg8[%c0_18, %c0_19, %c0_20] : memref<1x64x128xbf16, #tpu.memory_space<vmem>>, vector<1x64x128xbf16>
    %34 = vector.shape_cast %33 : vector<1x64x128xbf16> to vector<64x128xbf16>
    %35 = vector.shape_cast %32 : vector<64x128xbf16> to vector<1x64x128xbf16>
    tpu.vector_store %arg8[%c0_18, %c0_19, %c0_20], %35 {strides = array<i32>} : memref<1x64x128xbf16, #tpu.memory_space<vmem>>, vector<1x64x128xbf16>,
    return
  }
  func.func @transform_0(%arg0: i32, %arg1: i32) -> (i32, i32, i32) {
    %c0_i32 = arith.constant 0 : i32
    %c0_i32_0 = arith.constant 0 : i32
    return %arg0, %arg1, %c0_i32 : i32, i32, i32
  }
  func.func @transform_1(%arg0: i32, %arg1: i32) -> (i32, i32) {
    %c0_i32 = arith.constant 0 : i32
    %c0_i32_0 = arith.constant 0 : i32
    %c0_i32_1 = arith.constant 0 : i32
    return %c0_i32, %c0_i32_0 : i32, i32
  }
  func.func @transform_2(%arg0: i32, %arg1: i32) -> (i32, i32, i32) {
    %c0_i32 = arith.constant 0 : i32
    %c0_i32_0 = arith.constant 0 : i32
    %c0_i32_1 = arith.constant 0 : i32
    return %arg0, %c0_i32, %c0_i32_0 : i32, i32, i32
  }
  func.func @transform_3(%arg0: i32, %arg1: i32) -> (i32, i32, i32) {
    %c0_i32 = arith.constant 0 : i32
    %c0_i32_0 = arith.constant 0 : i32
    %c0_i32_1 = arith.constant 0 : i32
    return %arg0, %c0_i32, %c0_i32_0 : i32, i32, i32
  }
  func.func @transform_4(%arg0: i32, %arg1: i32) -> (i32, i32) {
    %c0_i32 = arith.constant 0 : i32
    %c0_i32_0 = arith.constant 0 : i32
    %c0_i32_1 = arith.constant 0 : i32
    return %c0_i32, %c0_i32_0 : i32, i32
  }
  func.func @transform_5(%arg0: i32, %arg1: i32) -> (i32, i32) {
    %c0_i32 = arith.constant 0 : i32
    %c0_i32_0 = arith.constant 0 : i32
    %c0_i32_1 = arith.constant 0 : i32
    return %c0_i32, %c0_i32_0 : i32, i32
  }
  func.func @transform_6(%arg0: i32, %arg1: i32) -> (i32, i32, i32) {
    %c0_i32 = arith.constant 0 : i32
    %c0_i32_0 = arith.constant 0 : i32
    return %arg0, %arg1, %c0_i32 : i32, i32, i32
  }
}

</mosaic_0001>

<bundles_post_ra>
// kernel: tpu_custom_call.1
= control target key start
LH: loop header
LB: loop body
LE: loop exit
PB: predicated region body
PF: predicated region fallthrough
CT: control target
= control target key end

     0   :  { %11 = vsyncpa [#allocation3], 0  ;;  %s1480_s0 = inlined_call_operand.hbm [shape: bf16[2,64,128], index: 0, kind: input, shape index: {}]   ;;  %s1481_s1 = inlined_call_operand.vmem [shape: f32[1,128], index: 1, kind: input, shape index: {}]   ;;  %s1482_s2 = inlined_call_operand.vmem [shape: f32[2,1,128], index: 2, kind: input, shape index: {}]   ;;  %s1483_s3 = inlined_call_operand.vmem [shape: f32[2,1,128], index: 3, kind: input, shape index: {}]   ;;  %s1484_s4 = inlined_call_operand.hbm [shape: bf16[128,128], index: 4, kind: input, shape index: {}]   ;;  %s1485_s5 = inlined_call_operand.vmem [shape: f32[1,128], index: 5, kind: input, shape index: {}]   ;;  %s1486_s6 = inlined_call_operand.hbm [shape: bf16[2,64,128], index: 6, kind: output, shape index: {}]  }
   0x1   :  { %13 = vsyncpa [#allocation3 + $0x1], 0 }
   0x2   :  { %14 = vsyncpa [#allocation6], 0 }
   0x3   :  { %15 = vsyncpa [#allocation4], 0 }
   0x4   :  { %17 = vsyncpa [#allocation4 + $0x1], 0  ;;  %s1193_s21 = smov 0   ;;  %s1195_s22 = smov 0  }
   0x5   :  { %s1197_s23 = smov 0   ;;  %s1199_s24 = smov 0  }
   0x6   :  { %s1201_s25 = smov 0   ;;  %s1203_s26 = smov 0  }
   0x7 LB: > { %s764_s27 = sadd.s32 4294967295, %s1149_s26   ;;  %s765_s28 = sadd.s32 4294967294, %s1149_s26   ;;  %s1149_s26 = sphi %s1203_s26, %s23_s26   ;;  %s1145_s25 = sphi %s1201_s25, %s1514_s25   ;;  %s1141_s24 = sphi %s1199_s24, %s1513_s24   ;;  %s1137_s23 = sphi %s1197_s23, %s1512_s23   ;;  %s1133_s22 = sphi %s1195_s22, %s1511_s22   ;;  %s1129_s21 = sphi %s1193_s21, %s1510_s21  }
   0x8   : > { %p57_p0 = scmp.ne.s32.totalorder %s1133_s22, %s1129_s21  ;;  %p1227_p1 = scmp.eq.s32.totalorder %s764_s27, 0 }
   0x9   : > { %p1231_p2 = scmp.eq.s32.totalorder %s764_s27, 1  ;;  %p204_p3 = scmp.eq.s32.totalorder %s765_s28, 1 }
   0xa   : > { %s1493_s29 = scalar_select %p1227_p1, 1, 0 }
   0xb   : > { %s1494_s30 = scalar_select %p1231_p2, 1, 0 }
   0xc   : > { %p1237_p4 = por %p1227_p1, %p57_p0  ;;  %p766_p5 = scmp.ge.s32.totalorder %s1149_s26, 1 }
   0xd   : > { %p1242_p6 = por %p204_p3, %p57_p0  ;;  %p211_p7 = scmp.lt.s32.totalorder %s1149_s26, 3 }
   0xe   : > { %s1495_s7 = scalar_select %p1237_p4, 1, 0 }
   0xf   : > { %s1496_s8 = scalar_select %p1242_p6, 1, 0 }
  0x10   : > { %p1247_p8 = pnand %p766_p5, %p211_p7  ;;  %s1151_s10 = smov [#allocation5]  }
  0x11   : > { %s226_s11 = sshll.u32 %s1151_s10, 4  ;;  %s35_s13 = sadd.s32 1, %s1145_s25  ;;  %s227_s11 = int_to_ptr.vmem [resolvable:$true] %s226_s11 }
  0x12   : > { %s1497_s9 = scalar_select %p1247_p8, 1, 0 }
  0x13   : > { %p912_p9 = pneg %p1247_p8  ;;  %s1005_s16 = scalar_lea.hbm %s1484_s4, 1024 }
  0x14   : > { %p1006_p12 = scmp.ne.s32.totalorder %s1484_s4, %s1005_s16  ;;  %p1012_p5 = scmp.lt.u32.totalorder %s1005_s16, %s1484_s4 }
  0x15   : > { %p1256_p11 = pnand %p912_p9, %p1227_p1 }
  0x17   : > { %p1007_p13 = pneg %p1256_p11 }
  0x19   : > { %p1008_p0 = pnand %p1007_p13, %p1006_p12 }
  0x1b   : > { %p1009_p3 = pneg %p1008_p0 }
  0x1d   : > { %p1014_p7 = pnand %p1012_p5, %p1009_p3 }
  0x1f   : > { %1017 = shalt.err (!%p1014_p7)
}
  0x20   : > { %s1018_s27 = scalar_lea.vmem %s227_s11, 1024  ;;  %p1026_p1 = scmp.lt.s32.totalorder %s227_s11, %s227_s11 }
  0x21   : > { %p1019_p9 = scmp.ne.s32.totalorder %s227_s11, %s1018_s27  ;;  %p1027_p4 = scmp.lt.s32.totalorder %s1018_s27, %s1018_s27 }
  0x23   : > { %p1021_p10 = pnand %p1019_p9, %p1007_p13  ;;  %p1028_p8 = por %p1027_p4, %p1026_p1 }
  0x25   : > { %p1022_p6 = pneg %p1021_p10 }
  0x27   : > { %p1029_p2 = pnand %p1028_p8, %p1022_p6 }
  0x29   : > { %1032 = shalt.err (!%p1029_p2)
}
  0x2a   : > { %s1491_s28 = smov 64   ;;  %s1492_s10 = smov 4  }
  0x2b   : > { %915 = dma.hbm_to_vmem [thread:$0]  (!%p1256_p11), %s1484_s4, 1024, %s227_s11, [#allocation6], %s1491_s28, %s1491_s28, %s1492_s10  }
  0x2c   : > { %p37_p1 = scmp.ge.s32.totalorder %s35_s13, 2  ;;  %s44_s16 = sadd.s32 1, %s1137_s23 }
  0x2d   : > { %p51_p2 = scmp.ne.s32.totalorder %s1137_s23, %s1133_s22  ;;  %p52_p4 = scmp.eq.s32.totalorder %s1149_s26, 0 }
  0x2e   : > { %s1516_s13 = smov (%p37_p1, %s35_s13), 0  ;;  %p1500_p8 = scmp.ne.s32.totalorder %s1494_s30, 0 }
  0x2f   : > { %p1286_p6 = por %p52_p4, %p51_p2  ;;  %s39_s18 = ssub.s32 %s1145_s25, %s1516_s13 }
  0x30   : > { %p1292_p10 = por %p1500_p8, %p51_p2  ;;  %p925_p12 = scmp.lt.s32.totalorder %s1149_s26, 2 }
  0x31   : > { %p42_p11 = scmp.eq.s32.totalorder %s39_s18, 0  ;;  %s243_s11 = sand.u32 1, %s1137_s23  }
  0x32   : > { %s769_s19 = sshll.u32 %s243_s11, 5  ;;  %s800_s27 = sshll.u32 %s1145_s25, 9 }
  0x33   : > { %s1301_s20 = scalar_select %p42_p11, %s1137_s23, %s44_s16  }
  0x34   : > { %s1307_s28 = scalar_lea.hbm %s1480_s0, %s800_s27  ;;  %s247_s30 = scalar_lea.vmem [#allocation2], %s769_s19 }
  0x35   : > { %s256_s10 = sshll.u32 %s247_s30, 4  ;;  %p1313_p13 = pnand %p925_p12, %p1286_p6  ;;  %s1309_s10 = int_to_ptr.vmem [resolvable:$true] %s256_s10 }
  0x36   : > { %s1317_s16 = scalar_lea.sflag [#allocation3], %s243_s11  ;;  %s1033_s14 = scalar_lea.hbm %s1307_s28, 512 }
  0x37   : > { %p1034_p0 = scmp.ne.s32.totalorder %s1307_s28, %s1033_s14  ;;  %p1035_p3 = pneg %p1313_p13 }
  0x38   : > { %s1038_s17 = scalar_lea.hbm %s1480_s0, 1024  ;;  %p1039_p9 = scmp.lt.u32.totalorder %s1307_s28, %s1480_s0 }
  0x39   : > { %p1036_p5 = pnand %p1035_p3, %p1034_p0  ;;  %p1040_p1 = scmp.lt.u32.totalorder %s1038_s17, %s1033_s14 }
  0x3a   : > { %p1042_p4 = scmp.lt.u32.totalorder %s1033_s14, %s1307_s28 }
  0x3b   : > { %p1037_p7 = pneg %p1036_p5  ;;  %p1041_p2 = por %p1040_p1, %p1039_p9 }
  0x3d   : > { %p1043_p6 = por %p1042_p4, %p1041_p2 }
  0x3f   : > { %p1044_p8 = pnand %p1043_p6, %p1037_p7 }
  0x41   : > { %1047 = shalt.err (!%p1044_p8)
}
  0x42   : > { %s1048_s11 = scalar_lea.vmem %s1309_s10, 512  ;;  %s1154_s19 = smov [#allocation2]  }
  0x43   : > { %p1049_p12 = scmp.ne.s32.totalorder %s1309_s10, %s1048_s11  ;;  %s1053_s27 = sshll.u32 %s1154_s19, 4  ;;  %s1054_s27 = int_to_ptr.vmem [resolvable:$false] %s1053_s27 }
  0x44   : > { %s1055_s15 = scalar_lea.vmem %s1054_s27, 1024  ;;  %p1056_p5 = scmp.lt.s32.totalorder %s1309_s10, %s1054_s27 }
  0x45   : > { %p1051_p11 = pnand %p1049_p12, %p1035_p3  ;;  %p1057_p9 = scmp.lt.s32.totalorder %s1055_s15, %s1048_s11 }
  0x47   : > { %p1052_p0 = pneg %p1051_p11  ;;  %p1058_p1 = por %p1057_p9, %p1056_p5 }
  0x49   : > { %p1059_p2 = pnand %p1058_p1, %p1052_p0 }
  0x4b   : > { %1062 = shalt.err (!%p1059_p2)
}
  0x4c   : > { %s1503_s14 = smov 4   ;;  %s1504_s17 = smov 64  }
  0x4d   : > { %919 = dma.hbm_to_vmem [thread:$0]  (!%p1313_p13), %s1307_s28, 512, %s1309_s10, %s1317_s16, %s1504_s17, %s1504_s17, %s1503_s14  }
  0x4e   : > { %p1505_p3 = scmp.ne.s32.totalorder %s1497_s9, 0 }
  0x4f   : > { %s1351_s30 = sand.u32 (!%p1505_p3), 1, %s1133_s22   ;;  %p1506_p7 = scmp.ne.s32.totalorder (!%p1505_p3), %s1495_s7, 0 }
  0x50   : > { %280 = sbr.rel (%p1505_p3) target bundleno = 510 (0x1fe), region = 44  ;;  %s773_s11 = sshll.u32 (!%p1505_p3), %s1351_s30, 5 }
  0x51   : > { %s283_s19 = scalar_lea.sflag (!%p1505_p3), [#allocation3], %s1351_s30  ;;  %s286_s18 = scalar_lea.vmem (!%p1505_p3), [#allocation2], %s773_s11 }
  0x57   : > { %1116 = dma.done.wait (%p1506_p7), %s283_s19, 512  }
  0x58   : > { %1118 = vsyncadd (%p1506_p7), %s283_s19, 4294966784  ;;  %p1507_p13 = scmp.ne.s32.totalorder %s1493_s29, 0 }
  0x5a   : > { %1120 = dma.done.wait (%p1507_p13), [#allocation6], 1024  }
  0x5b   : > { %1122 = vsyncadd (%p1507_p13), [#allocation6], 4294966272  ;;  %v847_v0 = vld [vmem:[%s286_s18 + $0x10] sm:$0xff]   ;;  %v811_v1 = vld [vmem:[%s286_s18] sm:$0xff]   ;;  %p326_p4 = scmp.lt.s32.totalorder %s1141_s24, 1  ;;  %v426_v38 = vlaneseq  ;;  %s809_s7 = sshll.u32 %s1141_s24, 9 }
  0x5c   : > { %v1365_v2 = vunpack.c.l.bf16 %v847_v0  ;;  %v1367_v3 = vunpack.c.l.bf16 %v811_v1  ;;  %v1369_v4 = vunpack.c.h.bf16 %v847_v0  ;;  %v1371_v5 = vunpack.c.h.bf16 %v811_v1  ;;  %v846_v6 = vld [vmem:[%s286_s18 + $0x8] sm:$0xff]   ;;  %v848_v13 = vld [vmem:[%s286_s18 + $0x18] sm:$0xff]   ;;  %v981_v20 = vld [vmem:[#allocation5] sm:$0xff]   ;;  %s324_s18 = scalar_lea.vmem [#allocation7], %s773_s11  ;;  %s1155_s16 = smov [#allocation7]  }
  0x5d   : > { %v1381_v11 = vunpack.c.h.bf16 %v846_v6  ;;  %v1383_v12 = vunpack.c.l.bf16 %v846_v6  ;;  %v1389_v16 = vunpack.c.h.bf16 %v848_v13  ;;  %v1391_v17 = vunpack.c.l.bf16 %v848_v13  ;;  %864 = vmatprep.subr.bf16.mxu0 %v981_v20  ;;  %888 = vmatprep.subr.bf16.mxu1 %v981_v20  ;;  %v982_v21 = vld [vmem:[#allocation5 + $0x8] sm:$0xff]   ;;  %v983_v22 = vld [vmem:[#allocation5 + $0x10] sm:$0xff]   ;;  %v984_v23 = vld [vmem:[#allocation5 + $0x18] sm:$0xff]   ;;  %s1399_s29 = scalar_select %p326_p4, %s1141_s24, 1 }
  0x5e   : > { %v357_v7 = vmul.f32 %v1365_v2, %v1365_v2  ;;  %v353_v8 = vmul.f32 %v1367_v3, %v1367_v3  ;;  %v358_v9 = vmul.f32 %v1369_v4, %v1369_v4  ;;  %v354_v10 = vmul.f32 %v1371_v5, %v1371_v5  ;;  %865 = vmatpush3.bf16.msra.mxu0 %v981_v20  ;;  %v985_v24 = vld [vmem:[#allocation5 + $0x20] sm:$0xff]   ;;  %v986_v25 = vld [vmem:[#allocation5 + $0x28] sm:$0xff]   ;;  %v987_v26 = vld [vmem:[#allocation5 + $0x30] sm:$0xff]   ;;  %s634_s24 = scalar_lea.sflag [#allocation4], %s1351_s30  ;;  %s1067_s27 = sshll.u32 %s1155_s16, 4  ;;  %s1068_s27 = int_to_ptr.vmem [resolvable:$false] %s1067_s27 }
  0x5f   : > { %v356_v14 = vmul.f32 %v1381_v11, %v1381_v11  ;;  %v355_v15 = vmul.f32 %v1383_v12, %v1383_v12  ;;  %v360_v18 = vmul.f32 %v1389_v16, %v1389_v16  ;;  %v359_v19 = vmul.f32 %v1391_v17, %v1391_v17  ;;  %896 = vmatpush3.bf16.msra.mxu1 %v981_v20  ;;  %v988_v27 = vld [vmem:[#allocation5 + $0x38] sm:$0xff]   ;;  %s331_s28 = scalar_lea.vmem %s1483_s3, %s1399_s29  ;;  %v776_v58 = vld [vmem:[%s1481_s1] ss:$0 sm:$0xff]  ;;  %s328_s14 = scalar_lea.vmem %s1482_s2, %s1399_s29 }
  0x60   : > { %369 = vadd.xlane.f32.xlu1 %v357_v7  ;;  %361 = vadd.xlane.f32.xlu0 %v353_v8  ;;  %v427_v45 = vshrl.u32 %v426_v38, 7  ;;  %v352_v48 = vld [vmem:[%s331_s28] sm:$0x1]  ;;  %s649_s29 = sshll.u32 %s324_s18, 4  ;;  %s1431_s28 = scalar_lea.hbm %s1486_s6, %s809_s7  ;;  %s1426_s29 = int_to_ptr.vmem [resolvable:$true] %s649_s29 }
  0x61   : > { %866 = vmatprep.subr.bf16.mxu0 %v982_v21  ;;  %889 = vmatprep.subr.bf16.mxu1 %v982_v21  ;;  %v424_v53 = vadd.f32 1.0, %v352_v48  ;;  %v777_v13 = vld [vmem:[%s328_s14] ss:$0 sm:$0xff]  ;;  %s1063_s10 = scalar_lea.vmem %s1426_s29, 512  ;;  %s1069_s15 = scalar_lea.vmem %s1068_s27, 1024 }
  0x62   : > { %867 = vmatpush3.bf16.msra.mxu0 %v982_v21  ;;  %v428_v54 = vsub.s32 0, %v427_v45  ;;  %p1064_p6 = scmp.ne.s32.totalorder %s1426_s29, %s1063_s10  ;;  %p1070_p11 = scmp.lt.s32.totalorder %s1426_s29, %s1068_s27 }
  0x63   : > { %897 = vmatpush3.bf16.msra.mxu1 %v982_v21  ;;  %868 = vmatprep.subr.bf16.mxu0 %v983_v22  ;;  %p1071_p0 = scmp.lt.s32.totalorder %s1069_s15, %s1063_s10 }
  0x64   : > { %371 = vadd.xlane.f32.xlu1 %v358_v9  ;;  %363 = vadd.xlane.f32.xlu0 %v354_v10  ;;  %v429_v62 = vrot.slane %v424_v53, %v428_v54  ;;  %p1065_p8 = pnand %p1064_p6, %p1292_p10 }
  0x65   : > { %890 = vmatprep.subr.bf16.mxu1 %v983_v22  ;;  %p1072_p5 = por %p1071_p0, %p1070_p11 }
  0x66   : > { %869 = vmatpush3.bf16.msra.mxu0 %v983_v22  ;;  %p1066_p12 = pneg %p1065_p8 }
  0x67   : > { %898 = vmatpush3.bf16.msra.mxu1 %v983_v22  ;;  %870 = vmatprep.subr.bf16.mxu0 %v984_v23 }
  0x68   : > { %367 = vadd.xlane.f32.xlu1 %v356_v14  ;;  %365 = vadd.xlane.f32.xlu0 %v355_v15  ;;  %p1073_p9 = pnand %p1072_p5, %p1066_p12 }
  0x69   : > { %891 = vmatprep.subr.bf16.mxu1 %v984_v23 }
  0x6a   : > { %871 = vmatpush3.bf16.msra.mxu0 %v984_v23 }
  0x6b   : > { %899 = vmatpush3.bf16.msra.mxu1 %v984_v23  ;;  %872 = vmatprep.subr.bf16.mxu0 %v985_v24 }
  0x6c   : > { %375 = vadd.xlane.f32.xlu1 %v360_v18  ;;  %373 = vadd.xlane.f32.xlu0 %v359_v19 }
  0x6d   : > { %892 = vmatprep.subr.bf16.mxu1 %v985_v24 }
  0x6e   : > { %873 = vmatpush3.bf16.msra.mxu0 %v985_v24 }
  0x6f   : > { %900 = vmatpush3.bf16.msra.mxu1 %v985_v24  ;;  %874 = vmatprep.subr.bf16.mxu0 %v986_v25 }
  0x70   : > { %893 = vmatprep.subr.bf16.mxu1 %v986_v25 }
  0x72   : > { %875 = vmatpush3.bf16.msra.mxu0 %v986_v25 }
  0x73   : > { %901 = vmatpush3.bf16.msra.mxu1 %v986_v25  ;;  %876 = vmatprep.subr.bf16.mxu0 %v987_v26 }
  0x74   : > { %894 = vmatprep.subr.bf16.mxu1 %v987_v26 }
  0x76   : > { %877 = vmatpush3.bf16.msra.mxu0 %v987_v26 }
  0x77   : > { %902 = vmatpush3.bf16.msra.mxu1 %v987_v26  ;;  %878 = vmatprep.subr.bf16.mxu0 %v988_v27 }
  0x78   : > { %895 = vmatprep.subr.bf16.mxu1 %v988_v27 }
  0x7a   : > { %879 = vmatpush3.bf16.msra.mxu0 %v988_v27 }
  0x7b   : > { %903 = vmatpush3.bf16.msra.mxu1 %v988_v27 }
  0xed   : > { %v370_v28 = vpop.xlane.xlu1 %369  ;;  %v362_v29 = vpop.xlane.xlu0 %361 }
  0xee   : > { %v382_v30 = vmul.f32 0.0078125, %v370_v28  ;;  %v378_v31 = vmul.f32 0.0078125, %v362_v29 }
  0xf0   : > { %v390_v32 = vadd.f32 1e-06, %v382_v30  ;;  %v386_v33 = vadd.f32 1e-06, %v378_v31 }
  0xf1   : > { %v372_v34 = vpop.xlane.xlu1 %371  ;;  %v364_v35 = vpop.xlane.xlu0 %363 }
  0xf2   : > { %989 = vrsqrt.f32 %v390_v32  ;;  %v383_v36 = vmul.f32 0.0078125, %v372_v34  ;;  %v379_v37 = vmul.f32 0.0078125, %v364_v35 }
  0xf3   : > { %991 = vrsqrt.f32 %v386_v33 }
  0xf4   : > { %v391_v39 = vadd.f32 1e-06, %v383_v36  ;;  %v387_v40 = vadd.f32 1e-06, %v379_v37 }
  0xf5   : > { %v368_v41 = vpop.xlane.xlu1 %367  ;;  %v366_v42 = vpop.xlane.xlu0 %365 }
  0xf6   : > { %993 = vrsqrt.f32 %v391_v39  ;;  %v381_v43 = vmul.f32 0.0078125, %v368_v41  ;;  %v380_v44 = vmul.f32 0.0078125, %v366_v42 }
  0xf7   : > { %995 = vrsqrt.f32 %v387_v40 }
  0xf8   : > { %v389_v46 = vadd.f32 1e-06, %v381_v43  ;;  %v388_v47 = vadd.f32 1e-06, %v380_v44 }
  0xf9   : > { %v376_v49 = vpop.xlane.xlu1 %375  ;;  %v374_v50 = vpop.xlane.xlu0 %373 }
  0xfa   : > { %997 = vrsqrt.f32 %v389_v46  ;;  %v385_v51 = vmul.f32 0.0078125, %v376_v49  ;;  %v384_v52 = vmul.f32 0.0078125, %v374_v50 }
  0xfb   : > { %999 = vrsqrt.f32 %v388_v47 }
  0xfc   : > { %v990_v55 = vpop.eup %989  ;;  %v393_v56 = vadd.f32 1e-06, %v385_v51  ;;  %v392_v57 = vadd.f32 1e-06, %v384_v52 }
  0xfd   : > { %v992_v59 = vpop.eup %991  ;;  %v406_v60 = vmul.f32 %v990_v55, %v1365_v2 }
  0xfe   : > { %1001 = vrsqrt.f32 %v393_v56  ;;  %v402_v61 = vmul.f32 %v992_v59, %v1367_v3 }
  0xff   : > { %1003 = vrsqrt.f32 %v392_v57  ;;  %v420_v63 = vmul.f32 %v776_v58, %v406_v60 }
 0x100   : > { %v994_v0 = vpop.eup %993  ;;  %v416_v1 = vmul.f32 %v776_v58, %v402_v61 }
 0x101   : > { %v996_v6 = vpop.eup %995  ;;  %v407_v7 = vmul.f32 %v994_v0, %v1369_v4  ;;  %v435_v10 = vmul.f32 %v429_v62, %v420_v63 }
 0x102   : > { %v403_v8 = vmul.f32 %v996_v6, %v1371_v5  ;;  %v431_v3 = vmul.f32 %v429_v62, %v416_v1 }
 0x103   : > { %v421_v9 = vmul.f32 %v776_v58, %v407_v7  ;;  %v449_v22 = vadd.f32 %v777_v13, %v435_v10 }
 0x104   : > { %v998_v2 = vpop.eup %997  ;;  %v417_v14 = vmul.f32 %v776_v58, %v403_v8  ;;  %v445_v4 = vadd.f32 %v777_v13, %v431_v3 }
 0x105   : > { %v1000_v15 = vpop.eup %999  ;;  %v436_v18 = vmul.f32 %v429_v62, %v421_v9  ;;  %v405_v19 = vmul.f32 %v998_v2, %v1381_v11 }
 0x106   : > { %v432_v20 = vmul.f32 %v429_v62, %v417_v14  ;;  %v404_v21 = vmul.f32 %v1000_v15, %v1383_v12 }
 0x107   : > { %v450_v23 = vadd.f32 %v777_v13, %v436_v18  ;;  %v419_v24 = vmul.f32 %v776_v58, %v405_v19 }
 0x108   : > { %v1002_v25 = vpop.eup %1001  ;;  %v446_v26 = vadd.f32 %v777_v13, %v432_v20  ;;  %v418_v5 = vmul.f32 %v776_v58, %v404_v21 }
 0x109   : > { %v1004_v27 = vpop.eup %1003  ;;  %v409_v28 = vmul.f32 %v1002_v25, %v1389_v16  ;;  %v455_v29 = vpack.c.bf16 %v450_v23, %v449_v22  ;;  %v434_v30 = vmul.f32 %v429_v62, %v419_v24 }
 0x10a   : > { %v408_v31 = vmul.f32 %v1004_v27, %v1391_v17  ;;  %v453_v32 = vpack.c.bf16 %v446_v26, %v445_v4  ;;  %v433_v33 = vmul.f32 %v429_v62, %v418_v5  ;;  %v778_v17 = vld [vmem:[%s1485_s5] ss:$0 sm:$0xff] }
 0x10b   : > { %884 = vmatprep.mubr.bf16.mxu1 %v455_v29  ;;  %v448_v11 = vadd.f32 %v777_v13, %v434_v30  ;;  %v423_v34 = vmul.f32 %v776_v58, %v409_v28 }
 0x10c   : > { %880 = vmatprep.mubr.bf16.mxu0 %v453_v32  ;;  %v447_v12 = vadd.f32 %v777_v13, %v433_v33  ;;  %v422_v35 = vmul.f32 %v776_v58, %v408_v31 }
 0x10d   : > { %v438_v36 = vmul.f32 %v429_v62, %v423_v34 }
 0x10e   : > { %v454_v37 = vpack.c.bf16 %v448_v11, %v447_v12  ;;  %v437_v38 = vmul.f32 %v429_v62, %v422_v35 }
 0x10f   : > { %v452_v39 = vadd.f32 %v777_v13, %v438_v36 }
 0x110   : > { %881 = vmatmul.mubr.bf16.vlgmr.msra.gmra.mrb[0].mxu0 %v454_v37  ;;  %v451_v40 = vadd.f32 %v777_v13, %v437_v38 }
 0x112   : > { %v456_v16 = vpack.c.bf16 %v452_v39, %v451_v40 }
 0x114   : > { %885 = vmatmul.mubr.bf16.vlgmr.msra.gmra.mrb[0].mxu1 %v456_v16 }
 0x1e3   : > { %v882_v41 = vpop.f32.mrb[0].mxu0 }
 0x1e4   : > { %v562_v42 = vpop.f32.mrb[1].mxu0  ;;  %v571_v44 = vadd.f32 %v882_v41, %v778_v17 }
 0x1e5   : > { %v883_v43 = vpop.f32.mrb[2].mxu0  ;;  %v563_v47 = vadd.f32 %v778_v17, %v562_v42 }
 0x1e6   : > { %v574_v45 = vadd.f32 %v883_v43, %v778_v17  ;;  %v565_v46 = vpop.f32.mrb[3].mxu0 }
 0x1e7   : > { %v566_v48 = vadd.f32 %v778_v17, %v565_v46  ;;  %v886_v49 = vpop.f32.mrb[0].mxu1 }
 0x1e8   : > { %v834_v50 = vpack.c.bf16 %v574_v45, %v571_v44  ;;  %v578_v51 = vpop.f32.mrb[1].mxu1  ;;  %v587_v54 = vadd.f32 %v886_v49, %v778_v17 }
 0x1e9   : > { %v829_v52 = vpack.c.bf16 %v566_v48, %v563_v47  ;;  %v887_v53 = vpop.f32.mrb[2].mxu1  ;;  %v579_v57 = vadd.f32 %v778_v17, %v578_v51 }
 0x1ea   : > { %849 = vst [vmem:[%s324_s18 + $0x8] sm:$0xff] %v834_v50   ;;  %v590_v55 = vadd.f32 %v887_v53, %v778_v17  ;;  %v581_v56 = vpop.f32.mrb[3].mxu1 }
 0x1eb   : > { %830 = vst [vmem:[%s324_s18] sm:$0xff] %v829_v52   ;;  %v582_v58 = vadd.f32 %v778_v17, %v581_v56 }
 0x1ec   : > { %v844_v59 = vpack.c.bf16 %v590_v55, %v587_v54 }
 0x1ed   : > { %v839_v60 = vpack.c.bf16 %v582_v58, %v579_v57 }
 0x1ee   : > { %851 = vst [vmem:[%s324_s18 + $0x18] sm:$0xff] %v844_v59  }
 0x1ef   : > { %850 = vst [vmem:[%s324_s18 + $0x10] sm:$0xff] %v839_v60  }
 0x1f0   : > { %1076 = shalt.err (!%p1073_p9)
}
 0x1f1   : > { %s1077_s14 = scalar_lea.hbm %s1431_s28, 512  ;;  %s1081_s18 = scalar_lea.hbm %s1486_s6, 1024 }
 0x1f2   : > { %p1078_p1 = scmp.ne.s32.totalorder %s1431_s28, %s1077_s14  ;;  %p1082_p7 = scmp.lt.u32.totalorder %s1431_s28, %s1486_s6 }
 0x1f3   : > { %p1083_p13 = scmp.lt.u32.totalorder %s1081_s18, %s1077_s14  ;;  %p1085_p6 = scmp.lt.u32.totalorder %s1077_s14, %s1431_s28 }
 0x1f4   : > { %p1079_p2 = pnand %p1078_p1, %p1292_p10 }
 0x1f5   : > { %p1084_p4 = por %p1083_p13, %p1082_p7 }
 0x1f6   : > { %p1080_p3 = pneg %p1079_p2 }
 0x1f7   : > { %p1086_p8 = por %p1085_p6, %p1084_p4 }
 0x1f9   : > { %p1087_p12 = pnand %p1086_p8, %p1080_p3 }
 0x1fb   : > { %1090 = shalt.err (!%p1087_p12)
}
 0x1fc   : > { %s1156_s9 = smov 64   ;;  %s1157_s10 = smov 4  }
 0x1fd   : > { %910 = dma.vmem_to_hbm [thread:$0]  (%p1292_p10), %s1426_s29, 512, %s1431_s28, %s634_s24, %s1156_s9, %s1156_s9, %s1157_s10  }
 0x1fe PF: > { %s664_s16 = sand.u32 1, %s1129_s21   ;;  %p1508_p11 = scmp.ne.s32.totalorder %s1496_s8, 0 }
 0x1ff   : > { %p1509_p0 = scmp.ge.s32.totalorder %s1149_s26, 2  ;;  %s665_s27 = scalar_lea.sflag [#allocation4], %s664_s16 }
 0x201   : > { %p921_p5 = pnand %p1509_p0, %p1508_p11 }
 0x203   : > { %1124 = dma.done.wait (!%p921_p5), %s665_s27, 512  }
 0x204   : > { %1126 = vsyncadd (!%p921_p5), %s665_s27, 4294966784  ;;  %s23_s26 = sadd.s32 1, %s1149_s26   ;;  %s1510_s21 = smov %s1133_s22 }
 0x205   : > { %p20_p9 = scmp.ge.s32.totalorder %s23_s26, 4   ;;  %s1511_s22 = smov %s1137_s23 }
 0x206   : > { %s1512_s23 = smov %s1301_s20  ;;  %s1513_s24 = smov %s1145_s25 }
 0x207   : > { %s1514_s25 = smov %s1516_s13  ;;  %22 = sbr.rel (!%p20_p9) target bundleno = 7 (0x7), region = 99 }
 0x20e   :  { %670 = vsyncpa [#allocation3], 1 }
 0x20f   :  { %672 = vsyncpa [#allocation3 + $0x1], 1 }
 0x210   :  { %673 = vsyncpa [#allocation6], 1 }
 0x211   :  { %674 = vsyncpa [#allocation4], 1 }
 0x212   :  { %676 = vsyncpa [#allocation4 + $0x1], 1 }

</bundles_post_ra>
